<compile_context>
chip_gen: v6e
topology: v6e:2x2x1
jax: 0.10.0
libtpu: 0.0.40
codegen_flags: <defaults>
</compile_context>

<pallas_src>
import math
from functools import partial

import jax
import jax.numpy as jnp
from jax import lax
from jax.experimental import pallas as pl
from jax.experimental.pallas import tpu as pltpu


# ----------------------------------------------------------------------------
# Config (HIDDEN/OUT_DIM fixed by nn.Linear(768, 128); rest is a small synthetic BERT)
# ----------------------------------------------------------------------------
HIDDEN = 768
OUT_DIM = 128
NUM_LAYERS = 2
NUM_HEADS = 12
HEAD_DIM = HIDDEN // NUM_HEADS
HEAD_PAIRS = NUM_HEADS // 2
FFN = 3072
VOCAB = 128
MAX_POS = 32
TYPE_VOCAB = 2
LN_EPS = 1e-12

ACT_DTYPE = jnp.bfloat16   # activation dtype between kernels (MXU-native)
WGT_DTYPE = jnp.bfloat16   # matmul weight storage dtype


def _detect_tm_max():
    """Token-dim tile cap: 512 on v6e (128 MiB VMEM), 256 on v5e / v7x (64 MiB VMEM,
    prefers grid depth for its 2 TensorCores over bigger tiles)."""
    try:
        kind = jax.devices()[0].device_kind.lower()
    except Exception:
        return 256
    return 512 if "v6" in kind else 256


_TM_MAX = _detect_tm_max()


def _pick_tile(n, cap):
    """Largest divisor of n <= cap, preferring lane-aligned (x128) then x8 tiles."""
    if n <= cap:
        return n
    best, best_rank = 1, -1
    for t in range(1, cap + 1):
        if n % t:
            continue
        rank = 2 if t % 128 == 0 else (1 if t % 8 == 0 else 0)
        if (rank, t) > (best_rank, best):
            best_rank, best = rank, t
    return best


def _pick_batch_tile(b, cap=8):
    """Batch tile for pooling: full batch if small, else a x8 divisor <= cap."""
    if b <= cap:
        return b
    for t in range(cap, 0, -1):
        if b % t == 0 and t % 8 == 0:
            return t
    return b


def _apply_activation(x, activation):
    if activation is None:
        return x
    if activation == "tanh":
        return jnp.tanh(x)
    if activation == "gelu":
        # TODO(synk): tanh-approx GELU; HF BERT default is the exact erf form (tiny drift).
        return 0.5 * x * (1.0 + jnp.tanh(0.7978845608028654 * (x + 0.044715 * x * x * x)))
    raise ValueError(activation)


# ----------------------------------------------------------------------------
# Pallas kernels
# ----------------------------------------------------------------------------
def _linear_kernel(x_ref, w_ref, b_ref, o_ref, *, activation):
    """o = act(x @ w + b) for one (tm, tn) tile. bf16 MXU inputs, f32 accumulate."""
    acc = jnp.dot(x_ref[...], w_ref[...], preferred_element_type=jnp.float32)
    acc = acc + b_ref[...]
    acc = _apply_activation(acc, activation)
    o_ref[...] = acc.astype(o_ref.dtype)


def _linear_add_ln_kernel(x_ref, w_ref, b_ref, r_ref, g_ref, be_ref, o_ref, *, eps):
    """o = LayerNorm(x @ w + b + residual) * g + be, fused matmul epilogue (N = full H)."""
    acc = jnp.dot(x_ref[...], w_ref[...], preferred_element_type=jnp.float32)
    acc = acc + b_ref[...] + r_ref[...].astype(jnp.float32)
    mean = jnp.mean(acc, axis=-1, keepdims=True)
    var = jnp.mean((acc - mean) * (acc - mean), axis=-1, keepdims=True)
    y = (acc - mean) * lax.rsqrt(var + eps)
    o_ref[...] = (y * g_ref[...] + be_ref[...]).astype(o_ref.dtype)


def _layernorm_kernel(x_ref, g_ref, b_ref, o_ref, *, eps):
    """o = LayerNorm(x) * g + b (no residual — embedding LN)."""
    x = x_ref[...].astype(jnp.float32)
    mean = jnp.mean(x, axis=-1, keepdims=True)
    var = jnp.mean((x - mean) * (x - mean), axis=-1, keepdims=True)
    y = (x - mean) * lax.rsqrt(var + eps)
    o_ref[...] = (y * g_ref[...] + b_ref[...]).astype(o_ref.dtype)


def _attention_kernel(qkv_ref, m_ref, o_ref):
    """One head-pair of one batch element per grid step.

    qkv_ref: (3, 2, S, D)  head-major packed [q|k|v] x [head0|head1] (bf16)
    m_ref:   (1, S)        additive attention mask (f32), broadcast over query rows
    o_ref:   (S, 2*D)      lane-dense 128-wide output slab (heads concatenated)

    1/sqrt(D) is pre-folded into the Q projection weights, so no scale multiply here.
    Only two (S, D) f32 intermediates are live -> no vreg spill / concat tree.
    """
    m = m_ref[...].astype(jnp.float32)                       # (1, S)
    outs = []
    for h in range(2):
        q = qkv_ref[0, h]                                    # (S, D) — leading-axis slice
        k = qkv_ref[1, h]
        v = qkv_ref[2, h]
        s = lax.dot_general(q, k, (((1,), (1,)), ((), ())),
                            preferred_element_type=jnp.float32) + m
        s = s - jnp.max(s, axis=-1, keepdims=True)
        p = jnp.exp(s)
        p = p * pl.reciprocal(jnp.sum(p, axis=-1, keepdims=True), approx=True)
        outs.append(jnp.dot(p.astype(v.dtype), v, preferred_element_type=jnp.float32))
    o_ref[...] = jnp.concatenate(outs, axis=-1).astype(o_ref.dtype)


def _mean_pool_kernel(x_ref, o_ref):
    """o[b, h] = mean_s x[b, s, h] (== torch.avg_pool1d with kernel_size = seq)."""
    o_ref[...] = jnp.mean(x_ref[...].astype(jnp.float32), axis=1).astype(o_ref.dtype)


# ----------------------------------------------------------------------------
# Pallas wrappers
# ----------------------------------------------------------------------------
def linear(x, w, b, activation=None, out_dtype=None, tm_max=None, tn_max=768):
    """y = act(x @ w + b). Grid is (N tiles, M tiles) with M innermost so the weight
    block is inner-loop-invariant (DMA'd once per N tile, not once per M tile)."""
    M, K = x.shape
    K2, N = w.shape
    assert K == K2
    tm = _pick_tile(M, tm_max if tm_max is not None else _TM_MAX)
    tn = _pick_tile(N, tn_max)
    out_dtype = out_dtype if out_dtype is not None else x.dtype
    kernel = partial(_linear_kernel, activation=activation)
    return pl.pallas_call(
        kernel,
        out_shape=jax.ShapeDtypeStruct((M, N), out_dtype),
        grid=(N // tn, M // tm),                      # j outer, i inner
        in_specs=[
            pl.BlockSpec((tm, K), lambda j, i: (i, 0)),
            pl.BlockSpec((K, tn), lambda j, i: (0, j)),   # invariant over inner axis
            pl.BlockSpec((1, tn), lambda j, i: (0, j)),
        ],
        out_specs=pl.BlockSpec((tm, tn), lambda j, i: (i, j)),
        compiler_params=pltpu.CompilerParams(
            dimension_semantics=("parallel", "parallel")),
    )(x, w, b.reshape(1, N))


def linear_add_layernorm(x, w, b, residual, gamma, beta, eps=LN_EPS,
                         out_dtype=None, tm_max=None):
    """act = x @ w + b; out = LayerNorm(act + residual). N must be the full hidden dim.
    Weight/bias/gamma/beta block indices are constant across the grid -> loaded once."""
    M, K = x.shape
    K2, N = w.shape
    assert K == K2 and residual.shape == (M, N)
    tm = _pick_tile(M, tm_max if tm_max is not None else _TM_MAX)
    out_dtype = out_dtype if out_dtype is not None else residual.dtype
    kernel = partial(_linear_add_ln_kernel, eps=eps)
    return pl.pallas_call(
        kernel,
        out_shape=jax.ShapeDtypeStruct((M, N), out_dtype),
        grid=(M // tm,),
        in_specs=[
            pl.BlockSpec((tm, K), lambda i: (i, 0)),
            pl.BlockSpec((K, N), lambda i: (0, 0)),
            pl.BlockSpec((1, N), lambda i: (0, 0)),
            pl.BlockSpec((tm, N), lambda i: (i, 0)),
            pl.BlockSpec((1, N), lambda i: (0, 0)),
            pl.BlockSpec((1, N), lambda i: (0, 0)),
        ],
        out_specs=pl.BlockSpec((tm, N), lambda i: (i, 0)),
        compiler_params=pltpu.CompilerParams(dimension_semantics=("parallel",)),
    )(x, w, b.reshape(1, N), residual, gamma.reshape(1, N), beta.reshape(1, N))


def layernorm(x, gamma, beta, eps=LN_EPS, out_dtype=None, tm_max=None):
    M, H = x.shape
    tm = _pick_tile(M, tm_max if tm_max is not None else _TM_MAX)
    out_dtype = out_dtype if out_dtype is not None else x.dtype
    kernel = partial(_layernorm_kernel, eps=eps)
    return pl.pallas_call(
        kernel,
        out_shape=jax.ShapeDtypeStruct((M, H), out_dtype),
        grid=(M // tm,),
        in_specs=[
            pl.BlockSpec((tm, H), lambda i: (i, 0)),
            pl.BlockSpec((1, H), lambda i: (0, 0)),
            pl.BlockSpec((1, H), lambda i: (0, 0)),
        ],
        out_specs=pl.BlockSpec((tm, H), lambda i: (i, 0)),
        compiler_params=pltpu.CompilerParams(dimension_semantics=("parallel",)),
    )(x, gamma.reshape(1, H), beta.reshape(1, H))


def fused_attention(qkv_t, mask_add):
    """qkv_t: (B, 3, NUM_HEADS, S, HEAD_DIM) head-major; mask_add: (B, 1, S) additive.

    Grid = (B, NUM_HEADS//2); each step writes one lane-dense (S, 128) slab directly into
    the (B, S, HIDDEN) merged-heads output (no output transpose needed).
    """
    B, three, nh, S, d = qkv_t.shape
    assert three == 3 and nh == NUM_HEADS and d == HEAD_DIM
    return pl.pallas_call(
        _attention_kernel,
        out_shape=jax.ShapeDtypeStruct((B, S, HIDDEN), qkv_t.dtype),
        grid=(B, HEAD_PAIRS),
        in_specs=[
            pl.BlockSpec((None, 3, 2, S, HEAD_DIM), lambda b, hp: (b, 0, hp, 0, 0)),
            pl.BlockSpec((None, 1, S), lambda b, hp: (b, 0, 0)),
        ],
        out_specs=pl.BlockSpec((None, S, 2 * HEAD_DIM), lambda b, hp: (b, 0, hp)),
        compiler_params=pltpu.CompilerParams(
            dimension_semantics=("parallel", "parallel")),
    )(qkv_t, mask_add)


def mean_pool(x):
    """Mean over axis 1 of (B, S, H), tiled over the batch axis."""
    B, S, H = x.shape
    tb = _pick_batch_tile(B)
    return pl.pallas_call(
        _mean_pool_kernel,
        out_shape=jax.ShapeDtypeStruct((B, H), x.dtype),
        grid=(B // tb,),
        in_specs=[pl.BlockSpec((tb, S, H), lambda i: (i, 0, 0))],
        out_specs=pl.BlockSpec((tb, H), lambda i: (i, 0)),
        compiler_params=pltpu.CompilerParams(dimension_semantics=("parallel",)),
    )(x)


# ----------------------------------------------------------------------------
# Parameter init (deterministic, synthetic — replaces pretrained BERT weights)
# ----------------------------------------------------------------------------
def init_params(key):
    ks = iter(jax.random.split(key, 16 + NUM_LAYERS * 16))

    def wf(shape, scale=0.02):
        return scale * jax.random.normal(next(ks), shape)          # f32

    def w(shape):
        return wf(shape).astype(WGT_DTYPE)

    def zeros(shape):
        return jnp.zeros(shape, jnp.float32)

    def ones(shape):
        return jnp.ones(shape, jnp.float32)

    params = {
        "word_emb": wf((VOCAB, HIDDEN)),
        "pos_emb": wf((MAX_POS, HIDDEN)),
        "type_emb": wf((TYPE_VOCAB, HIDDEN)),
        "emb_ln_g": ones((HIDDEN,)),
        "emb_ln_b": zeros((HIDDEN,)),
        "pooler_w": w((HIDDEN, HIDDEN)),
        "pooler_b": zeros((HIDDEN,)),
        "dense_w": w((HIDDEN, OUT_DIM)),   # nn.Linear(768, 128)
        "dense_b": zeros((OUT_DIM,)),
        "layers": [],
    }
    inv_sqrt_d = 1.0 / math.sqrt(HEAD_DIM)
    for _ in range(NUM_LAYERS):
        # fused QKV projection: [Q | K | V] along the output dim; the 1/sqrt(head_dim)
        # attention scale is folded into the Q columns (host-side, one-time).
        wqkv_f = wf((HIDDEN, 3 * HIDDEN))
        wqkv_f = wqkv_f.at[:, :HIDDEN].multiply(inv_sqrt_d)
        bqkv_f = zeros((3 * HIDDEN,)).at[:HIDDEN].multiply(inv_sqrt_d)
        params["layers"].append({
            "wqkv": wqkv_f.astype(WGT_DTYPE), "bqkv": bqkv_f,
            "wo": w((HIDDEN, HIDDEN)), "bo": zeros((HIDDEN,)),
            "ln1_g": ones((HIDDEN,)), "ln1_b": zeros((HIDDEN,)),
            "w1": w((HIDDEN, FFN)), "b1": zeros((FFN,)),
            "w2": w((FFN, HIDDEN)), "b2": zeros((HIDDEN,)),
            "ln2_g": ones((HIDDEN,)), "ln2_b": zeros((HIDDEN,)),
        })
    return params


# ----------------------------------------------------------------------------
# Forward pass (== SimcseModel.forward)
# ----------------------------------------------------------------------------
def simcse_forward(params, input_ids, attention_mask, token_type_ids, pooling="cls"):
    B, S = input_ids.shape

    # ---- embeddings (gather is glue; LayerNorm runs in Pallas) ----
    # TODO(synk): embedding gather kept in plain JAX (data-dependent row gather).
    we = jnp.take(params["word_emb"], input_ids, axis=0)            # (B,S,H)
    pe = params["pos_emb"][:S][None, :, :]                          # (1,S,H)
    te = jnp.take(params["type_emb"], token_type_ids, axis=0)       # (B,S,H)
    emb = (we + pe + te).reshape(B * S, HIDDEN).astype(ACT_DTYPE)   # bf16 DMA into LN
    x = layernorm(emb, params["emb_ln_g"], params["emb_ln_b"], out_dtype=ACT_DTYPE)

    # additive attention mask kept at (B, 1, S); broadcast happens inside the kernel
    mask_add = ((1.0 - attention_mask.astype(jnp.float32)) * -10000.0)[:, None, :]

    first_layer_hidden = None

    # ---- transformer encoder layers ----
    for li, layer in enumerate(params["layers"]):
        qkv = linear(x, layer["wqkv"], layer["bqkv"])                       # (B*S, 3H)
        # glue transpose to head-major (B, 3, NH, S, D) so the attention kernel never
        # lane-slices at 64-lane offsets and heads become a grid axis.
        qkv_t = qkv.reshape(B, S, 3, NUM_HEADS, HEAD_DIM).transpose(0, 2, 3, 1, 4)
        attn = fused_attention(qkv_t, mask_add)                             # (B, S, H)
        attn = attn.reshape(B * S, HIDDEN)
        # out-proj + residual + LayerNorm fused into one kernel
        x = linear_add_layernorm(attn, layer["wo"], layer["bo"],
                                 x, layer["ln1_g"], layer["ln1_b"])
        ff = linear(x, layer["w1"], layer["b1"], activation="gelu")         # (B*S, FFN)
        # FFN w2 + residual + LayerNorm fused
        x = linear_add_layernorm(ff, layer["w2"], layer["b2"],
                                 x, layer["ln2_g"], layer["ln2_b"])
        if li == 0 and pooling == "first-last-avg":
            first_layer_hidden = x      # only kept when actually needed

    last_hidden = x.reshape(B, S, HIDDEN)

    # ---- pooling ----
    if pooling == "cls":
        pooled = last_hidden[:, 0, :]                                 # (B,H)
    elif pooling == "pooler":
        pooled = linear(last_hidden[:, 0, :], params["pooler_w"], params["pooler_b"],
                        activation="tanh")
    elif pooling == "last-avg":
        pooled = mean_pool(last_hidden)                               # avg_pool1d over seq
    elif pooling == "first-last-avg":
        first_avg = mean_pool(first_layer_hidden.reshape(B, S, HIDDEN))
        last_avg = mean_pool(last_hidden)
        stacked = jnp.stack([first_avg, last_avg], axis=1)            # (B,2,H)
        pooled = mean_pool(stacked)                                   # avg_pool1d kernel_size=2
    else:
        raise ValueError(pooling)

    # ---- dense head: Linear(768,128) + Tanh, fused in the matmul kernel ----
    return linear(pooled, params["dense_w"], params["dense_b"],
                  activation="tanh", out_dtype=jnp.float32)


# ----------------------------------------------------------------------------
if __name__ == "__main__":
    key = jax.random.PRNGKey(0)
    pkey, ikey = jax.random.split(key)
    params = init_params(pkey)

    B, S = 2, 8
    input_ids = jax.random.randint(ikey, (B, S), 0, VOCAB, dtype=jnp.int32)
    attention_mask = jnp.ones((B, S), dtype=jnp.int32)
    token_type_ids = jnp.zeros((B, S), dtype=jnp.int32)

    out = simcse_forward(params, input_ids, attention_mask, token_type_ids, pooling="cls")
    out = jax.block_until_ready(out)
    assert out.shape == (B, OUT_DIM), out.shape
    assert bool(jnp.all(jnp.isfinite(out)))
    print("KERNEL_OK")
</pallas_src>

<mosaic_0001>
module attributes {stable_mosaic.version = 11 : i64} {
  func.func @_layernorm_kernel(%arg0: i32, %arg1: memref<16x768xbf16, #tpu.memory_space<vmem>>, %arg2: memref<1x768xf32, #tpu.memory_space<vmem>>, %arg3: memref<1x768xf32, #tpu.memory_space<vmem>>, %arg4: memref<16x768xbf16, #tpu.memory_space<vmem>>) attributes {dimension_semantics = [#tpu.dimension_semantics<parallel>], iteration_bounds = array<i64: 1>, scalar_prefetch = 0 : i64, scratch_operands = 0 : i64, tpu.core_type = #tpu.core_type<tc>, window_params = [{transform_indices = @transform_0, window_bounds = array<i64: 16, 768>}, {pipeline_mode = #tpu.pipeline_mode<synchronous>, transform_indices = @transform_1, window_bounds = array<i64: 1, 768>}, {pipeline_mode = #tpu.pipeline_mode<synchronous>, transform_indices = @transform_2, window_bounds = array<i64: 1, 768>}, {transform_indices = @transform_3, window_bounds = array<i64: 16, 768>}]} {
    %c0 = arith.constant 0 : index
    %c0_0 = arith.constant 0 : index
    %0 = vector.load %arg1[%c0, %c0_0] : memref<16x768xbf16, #tpu.memory_space<vmem>>, vector<16x768xbf16>
    %1 = arith.extf %0 : vector<16x768xbf16> to vector<16x768xf32>
    %cst = arith.constant dense<0.000000e+00> : vector<16xf32>
    %2 = vector.multi_reduction <add>, %1, %cst [1] : vector<16x768xf32> to vector<16xf32>
    %3 = vector.shape_cast %2 : vector<16xf32> to vector<16x1xf32>
    %cst_1 = arith.constant 7.680000e+02 : f32
    %4 = vector.broadcast %cst_1 : f32 to vector<16x1xf32>
    %5 = arith.divf %3, %4 : vector<16x1xf32>
    %6 = vector.broadcast %5 : vector<16x1xf32> to vector<16x768xf32>
    %7 = arith.subf %1, %6 : vector<16x768xf32>
    %8 = vector.broadcast %5 : vector<16x1xf32> to vector<16x768xf32>
    %9 = arith.subf %1, %8 : vector<16x768xf32>
    %10 = arith.mulf %7, %9 : vector<16x768xf32>
    %cst_2 = arith.constant dense<0.000000e+00> : vector<16xf32>
    %11 = vector.multi_reduction <add>, %10, %cst_2 [1] : vector<16x768xf32> to vector<16xf32>
    %12 = vector.shape_cast %11 : vector<16xf32> to vector<16x1xf32>
    %cst_3 = arith.constant 7.680000e+02 : f32
    %13 = vector.broadcast %cst_3 : f32 to vector<16x1xf32>
    %14 = arith.divf %12, %13 : vector<16x1xf32>
    %15 = vector.broadcast %5 : vector<16x1xf32> to vector<16x768xf32>
    %16 = arith.subf %1, %15 : vector<16x768xf32>
    %cst_4 = arith.constant 9.99999996E-13 : f32
    %17 = vector.broadcast %cst_4 : f32 to vector<16x1xf32>
    %18 = arith.addf %14, %17 : vector<16x1xf32>
    %19 = math.rsqrt %18 : vector<16x1xf32>
    %20 = vector.broadcast %19 : vector<16x1xf32> to vector<16x768xf32>
    %21 = arith.mulf %16, %20 : vector<16x768xf32>
    %c0_5 = arith.constant 0 : index
    %c0_6 = arith.constant 0 : index
    %22 = vector.load %arg2[%c0_5, %c0_6] : memref<1x768xf32, #tpu.memory_space<vmem>>, vector<1x768xf32>
    %23 = vector.broadcast %22 : vector<1x768xf32> to vector<16x768xf32>
    %24 = arith.mulf %21, %23 : vector<16x768xf32>
    %c0_7 = arith.constant 0 : index
    %c0_8 = arith.constant 0 : index
    %25 = vector.load %arg3[%c0_7, %c0_8] : memref<1x768xf32, #tpu.memory_space<vmem>>, vector<1x768xf32>
    %26 = vector.broadcast %25 : vector<1x768xf32> to vector<16x768xf32>
    %27 = arith.addf %24, %26 : vector<16x768xf32>
    %28 = arith.truncf %27 : vector<16x768xf32> to vector<16x768xbf16>
    %c0_9 = arith.constant 0 : index
    %c0_10 = arith.constant 0 : index
    %29 = vector.load %arg4[%c0_9, %c0_10] : memref<16x768xbf16, #tpu.memory_space<vmem>>, vector<16x768xbf16>
    tpu.vector_store %arg4[%c0_9, %c0_10], %28 {strides = array<i32>} : memref<16x768xbf16, #tpu.memory_space<vmem>>, vector<16x768xbf16>,
    return
  }
  func.func @transform_0(%arg0: i32) -> (i32, i32) {
    %c0_i32 = arith.constant 0 : i32
    %c0_i32_0 = arith.constant 0 : i32
    return %arg0, %c0_i32 : i32, i32
  }
  func.func @transform_1(%arg0: i32) -> (i32, i32) {
    %c0_i32 = arith.constant 0 : i32
    %c0_i32_0 = arith.constant 0 : i32
    %c0_i32_1 = arith.constant 0 : i32
    return %c0_i32, %c0_i32_0 : i32, i32
  }
  func.func @transform_2(%arg0: i32) -> (i32, i32) {
    %c0_i32 = arith.constant 0 : i32
    %c0_i32_0 = arith.constant 0 : i32
    %c0_i32_1 = arith.constant 0 : i32
    return %c0_i32, %c0_i32_0 : i32, i32
  }
  func.func @transform_3(%arg0: i32) -> (i32, i32) {
    %c0_i32 = arith.constant 0 : i32
    %c0_i32_0 = arith.constant 0 : i32
    return %arg0, %c0_i32 : i32, i32
  }
}

</mosaic_0001>

<bundles_post_ra>
// kernel: tpu_custom_call.1
= control target key start
LH: loop header
LB: loop body
LE: loop exit
PB: predicated region body
PF: predicated region fallthrough
CT: control target
= control target key end

     0   :  { %8 = vsyncpa [#allocation3], 0  ;;  %s488_s0 = inlined_call_operand.hbm [shape: bf16[16,768], index: 0, kind: input, shape index: {}]   ;;  %s489_s1 = inlined_call_operand.hbm [shape: f32[1,768], index: 1, kind: input, shape index: {}]   ;;  %s490_s2 = inlined_call_operand.hbm [shape: f32[1,768], index: 2, kind: input, shape index: {}]   ;;  %s491_s3 = inlined_call_operand.hbm [shape: bf16[16,768], index: 3, kind: output, shape index: {}]  }
   0x1   :  { %9 = vsyncpa [#allocation6], 0 }
   0x2   :  { %10 = vsyncpa [#allocation4], 0  ;;  %s399_s12 = smov [#allocation5]   ;;  %s400_s14 = smov [#allocation2]  }
   0x3   :  { %s29_s13 = sshll.u32 %s399_s12, 4  ;;  %s16_s15 = sshll.u32 %s400_s14, 4  ;;  %s30_s13 = int_to_ptr.vmem [resolvable:$true] %s29_s13  ;;  %s17_s15 = int_to_ptr.vmem [resolvable:$true] %s16_s15 }
   0x4   :  { %s321_s16 = scalar_lea.vmem %s30_s13, 96  ;;  %p326_p1 = scmp.lt.s32.totalorder %s30_s13, %s30_s13 }
   0x5   :  { %p322_p0 = scmp.ne.s32.totalorder %s30_s13, %s321_s16  ;;  %p327_p2 = scmp.lt.s32.totalorder %s321_s16, %s321_s16 }
   0x7   :  { %p328_p3 = por %p327_p2, %p326_p1 }
   0x9   :  { %p329_p4 = pnand %p328_p3, %p322_p0 }
   0xb   :  { %332 = shalt.err (!%p329_p4)
}
   0xc   :  { %32 = dma.hbm_to_vmem [thread:$0]  %s489_s1, 96, %s30_s13, [#allocation6]  }
   0xd   :  { %s341_s19 = scalar_lea.vmem %s17_s15, 768  ;;  %p346_p6 = scmp.lt.s32.totalorder %s17_s15, %s17_s15 }
   0xe   :  { %p342_p5 = scmp.ne.s32.totalorder %s17_s15, %s341_s19  ;;  %p347_p7 = scmp.lt.s32.totalorder %s341_s19, %s341_s19 }
  0x10   :  { %p348_p8 = por %p347_p7, %p346_p6 }
  0x12   :  { %p349_p9 = pnand %p348_p8, %p342_p5 }
  0x14   :  { %352 = shalt.err (!%p349_p9)
}
  0x15   :  { %s401_s20 = smov 384   ;;  %s402_s21 = smov 24  }
  0x16   :  { %22 = dma.hbm_to_vmem [thread:$0]  %s488_s0, 768, %s17_s15, [#allocation3], %s401_s20, %s401_s20, %s402_s21  }
  0x17   :  { %s403_s24 = smov [#allocation7]  }
  0x18   :  { %s39_s25 = sshll.u32 %s403_s24, 4  ;;  %s40_s25 = int_to_ptr.vmem [resolvable:$true] %s39_s25 }
  0x19   :  { %s361_s1 = scalar_lea.vmem %s40_s25, 96  ;;  %p366_p11 = scmp.lt.s32.totalorder %s40_s25, %s40_s25 }
  0x1a   :  { %p362_p10 = scmp.ne.s32.totalorder %s40_s25, %s361_s1  ;;  %p367_p12 = scmp.lt.s32.totalorder %s361_s1, %s361_s1 }
  0x1c   :  { %p368_p13 = por %p367_p12, %p366_p11 }
  0x1e   :  { %p369_p0 = pnand %p368_p13, %p362_p10 }
  0x20   :  { %372 = shalt.err (!%p369_p0)
}
  0x21   :  { %42 = dma.hbm_to_vmem [thread:$0]  %s490_s2, 96, %s40_s25, [#allocation6]  }
  0x22   :  { %393 = dma.done.wait [#allocation3], 768  }
  0x23   :  { %394 = vsyncadd [#allocation3], 4294966528 }
  0x24   :  { %395 = dma.done.wait [#allocation6], 192  }
  0x25   :  { %396 = vsyncadd [#allocation6], 4294967104  ;;  %v52_v0 = vld [vmem:[#allocation2] sm:$0xff]  ;;  %v53_v1 = vld [vmem:[#allocation2 + $0x8] sm:$0xff]  ;;  %s404_s0 = smov [#allocation8]  }
  0x26   :  { %v58_v2 = vunpack.c.l.bf16 %v52_v0  ;;  %v59_v3 = vunpack.c.h.bf16 %v52_v0  ;;  %v60_v4 = vunpack.c.l.bf16 %v53_v1  ;;  %v55_v5 = vld [vmem:[#allocation2 + $0x18] sm:$0xff]  ;;  %v56_v6 = vld [vmem:[#allocation2 + $0x20] sm:$0xff]  ;;  %v54_v7 = vld [vmem:[#allocation2 + $0x10] sm:$0xff]  ;;  %v61_v10 = vunpack.c.h.bf16 %v53_v1  ;;  %s278_s2 = sshll.u32 %s404_s0, 4  ;;  %s279_s2 = int_to_ptr.vmem [resolvable:$true] %s278_s2 }
  0x27   :  { %v64_v8 = vunpack.c.l.bf16 %v55_v5  ;;  %v65_v9 = vunpack.c.h.bf16 %v55_v5  ;;  %v57_v12 = vld [vmem:[#allocation2 + $0x28] sm:$0xff]  ;;  %v66_v13 = vunpack.c.l.bf16 %v56_v6  ;;  %v67_v14 = vunpack.c.h.bf16 %v56_v6  ;;  %s373_s28 = scalar_lea.vmem %s279_s2, 768  ;;  %p378_p2 = scmp.lt.s32.totalorder %s279_s2, %s279_s2 }
  0x28   :  { %v70_v11 = vadd.f32 %v59_v3, %v58_v2  ;;  %v62_v16 = vunpack.c.l.bf16 %v54_v7  ;;  %v68_v18 = vunpack.c.l.bf16 %v57_v12  ;;  %v63_v20 = vunpack.c.h.bf16 %v54_v7  ;;  %p374_p1 = scmp.ne.s32.totalorder %s279_s2, %s373_s28  ;;  %p379_p3 = scmp.lt.s32.totalorder %s373_s28, %s373_s28 }
  0x29   :  { %v77_v15 = vadd.f32 %v65_v9, %v64_v8  ;;  %v69_v24 = vunpack.c.h.bf16 %v57_v12  ;;  %v145_v7 = vlaneseq }
  0x2a   :  { %v71_v17 = vadd.f32 %v70_v11, %v60_v4  ;;  %p380_p4 = por %p379_p3, %p378_p2 }
  0x2b   :  { %v78_v19 = vadd.f32 %v77_v15, %v66_v13 }
  0x2c   :  { %v72_v21 = vadd.f32 %v71_v17, %v61_v10  ;;  %v187_v17 = vld [vmem:[#allocation7] sm:$0x3f]  ;;  %p381_p5 = pnand %p380_p4, %p374_p1 }
  0x2d   :  { %v79_v22 = vadd.f32 %v78_v19, %v67_v14 }
  0x2e   :  { %v73_v23 = vadd.f32 %v72_v21, %v62_v16 }
  0x2f   :  { %v80_v25 = vadd.f32 %v79_v22, %v68_v18 }
  0x30   :  { %v74_v26 = vadd.f32 %v73_v23, %v63_v20 }
  0x31   :  { %v81_v27 = vadd.f32 %v80_v25, %v69_v24 }
  0x32   :  { %75 = vadd.xlane.f32.xlu0 %v74_v26 }
  0x36   :  { %82 = vadd.xlane.f32.xlu0 %v81_v27 }
  0xbb   :  { %v76_v28 = vpop.xlane.xlu0 %75 }
  0xbc   :  { %v85_v29 = vmul.f32 0.0013020834, %v76_v28 }
  0xbe   :  { %v437_v30 = vsub.f32 %v58_v2, %v85_v29  ;;  %v439_v31 = vsub.f32 %v59_v3, %v85_v29  ;;  %v441_v32 = vsub.f32 %v60_v4, %v85_v29  ;;  %v443_v34 = vsub.f32 %v61_v10, %v85_v29 }
  0xbf   :  { %v83_v33 = vpop.xlane.xlu0 %82  ;;  %v91_v38 = vsub.f32 %v62_v16, %v85_v29  ;;  %v92_v44 = vsub.f32 %v63_v20, %v85_v29 }
  0xc0   :  { %v86_v35 = vmul.f32 0.0013020834, %v83_v33  ;;  %v99_v36 = vmul.f32 %v437_v30, %v437_v30  ;;  %v100_v37 = vmul.f32 %v439_v31, %v439_v31  ;;  %v101_v39 = vmul.f32 %v441_v32, %v441_v32 }
  0xc1   :  { %v102_v45 = vmul.f32 %v443_v34, %v443_v34  ;;  %v103_v50 = vmul.f32 %v91_v38, %v91_v38  ;;  %v104_v55 = vmul.f32 %v92_v44, %v92_v44 }
  0xc2   :  { %v111_v40 = vadd.f32 %v100_v37, %v99_v36  ;;  %v451_v41 = vsub.f32 %v64_v8, %v86_v35  ;;  %v453_v42 = vsub.f32 %v65_v9, %v86_v35  ;;  %v455_v43 = vsub.f32 %v66_v13, %v86_v35 }
  0xc3   :  { %v459_v47 = vsub.f32 %v67_v14, %v86_v35  ;;  %v465_v52 = vsub.f32 %v68_v18, %v86_v35  ;;  %v98_v57 = vsub.f32 %v69_v24, %v86_v35  ;;  %v146_v9 = vshrl.u32 %v145_v7, 7  ;;  %v143_v14 = vld [vmem:[#allocation5] sm:$0x3f] }
  0xc4   :  { %v112_v46 = vadd.f32 %v111_v40, %v101_v39  ;;  %v105_v48 = vmul.f32 %v451_v41, %v451_v41  ;;  %v106_v49 = vmul.f32 %v453_v42, %v453_v42  ;;  %v107_v53 = vmul.f32 %v455_v43, %v455_v43 }
  0xc5   :  { %v108_v58 = vmul.f32 %v459_v47, %v459_v47  ;;  %v109_v61 = vmul.f32 %v465_v52, %v465_v52  ;;  %v110_v63 = vmul.f32 %v98_v57, %v98_v57  ;;  %v147_v10 = vsub.s32 0, %v146_v9 }
  0xc6   :  { %v113_v51 = vadd.f32 %v112_v46, %v102_v45  ;;  %v118_v54 = vadd.f32 %v106_v49, %v105_v48  ;;  %v151_v11 = vsub.s32 1, %v146_v9  ;;  %v155_v12 = vsub.s32 2, %v146_v9 }
  0xc7   :  { %v159_v13 = vsub.s32 3, %v146_v9  ;;  %v163_v15 = vsub.s32 4, %v146_v9  ;;  %v167_v16 = vsub.s32 5, %v146_v9  ;;  %v148_v18 = vrot.slane %v143_v14, %v147_v10 }
  0xc8   :  { %v114_v56 = vadd.f32 %v113_v51, %v103_v50  ;;  %v119_v59 = vadd.f32 %v118_v54, %v107_v53  ;;  %v152_v19 = vrot.slane %v143_v14, %v151_v11  ;;  %v156_v20 = vrot.slane %v143_v14, %v155_v12 }
  0xc9   :  { %v160_v21 = vrot.slane %v143_v14, %v159_v13  ;;  %v164_v23 = vrot.slane %v143_v14, %v163_v15  ;;  %v168_v24 = vrot.slane %v143_v14, %v167_v16  ;;  %v192_v25 = vrot.slane %v187_v17, %v147_v10 }
  0xca   :  { %v115_v60 = vadd.f32 %v114_v56, %v104_v55  ;;  %v120_v62 = vadd.f32 %v119_v59, %v108_v58  ;;  %v196_v26 = vrot.slane %v187_v17, %v151_v11  ;;  %v200_v37 = vrot.slane %v187_v17, %v155_v12 }
  0xcb   :  { %v204_v39 = vrot.slane %v187_v17, %v159_v13  ;;  %v208_v46 = vrot.slane %v187_v17, %v163_v15  ;;  %v212_v48 = vrot.slane %v187_v17, %v167_v16 }
  0xcc   :  { %116 = vadd.xlane.f32.xlu1 %v115_v60  ;;  %v121_v0 = vadd.f32 %v120_v62, %v109_v61 }
  0xce   :  { %v122_v1 = vadd.f32 %v121_v0, %v110_v63 }
  0xd0   :  { %123 = vadd.xlane.f32.xlu1 %v122_v1 }
 0x155   :  { %v117_v2 = vpop.xlane.xlu1 %116 }
 0x156   :  { %v125_v3 = vmul.f32 0.0013020834, %v117_v2 }
 0x158   :  { %v127_v4 = vadd.f32 1e-12, %v125_v3 }
 0x159   :  { %v124_v5 = vpop.xlane.xlu1 %123 }
 0x15a   :  { %309 = vrsqrt.f32 %v127_v4  ;;  %v126_v6 = vmul.f32 0.0013020834, %v124_v5 }
 0x15c   :  { %v128_v8 = vadd.f32 1e-12, %v126_v6 }
 0x15e   :  { %311 = vrsqrt.f32 %v128_v8 }
 0x167   :  { %v310_v22 = vpop.eup %309 }
 0x168   :  { %v131_v27 = vmul.f32 %v310_v22, %v437_v30  ;;  %v132_v28 = vmul.f32 %v310_v22, %v439_v31  ;;  %v133_v29 = vmul.f32 %v310_v22, %v441_v32  ;;  %v134_v33 = vmul.f32 %v310_v22, %v443_v34 }
 0x169   :  { %v135_v35 = vmul.f32 %v310_v22, %v91_v38  ;;  %v136_v36 = vmul.f32 %v310_v22, %v92_v44 }
 0x16a   :  { %v175_v40 = vmul.f32 %v148_v18, %v131_v27  ;;  %v176_v45 = vmul.f32 %v152_v19, %v132_v28  ;;  %v177_v50 = vmul.f32 %v156_v20, %v133_v29  ;;  %v178_v51 = vmul.f32 %v160_v21, %v134_v33 }
 0x16b   :  { %v312_v49 = vpop.eup %311  ;;  %v179_v53 = vmul.f32 %v164_v23, %v135_v35  ;;  %v180_v54 = vmul.f32 %v168_v24, %v136_v36 }
 0x16c   :  { %v137_v30 = vmul.f32 %v312_v49, %v451_v41  ;;  %v138_v31 = vmul.f32 %v312_v49, %v453_v42  ;;  %v139_v32 = vmul.f32 %v312_v49, %v455_v43  ;;  %v140_v34 = vmul.f32 %v312_v49, %v459_v47 }
 0x16d   :  { %v141_v38 = vmul.f32 %v312_v49, %v465_v52  ;;  %v142_v44 = vmul.f32 %v312_v49, %v98_v57  ;;  %v219_v55 = vadd.f32 %v192_v25, %v175_v40  ;;  %v220_v56 = vadd.f32 %v196_v26, %v176_v45 }
 0x16e   :  { %v181_v58 = vmul.f32 %v148_v18, %v137_v30  ;;  %v182_v59 = vmul.f32 %v152_v19, %v138_v31  ;;  %v183_v60 = vmul.f32 %v156_v20, %v139_v32  ;;  %v184_v61 = vmul.f32 %v160_v21, %v140_v34 }
 0x16f   :  { %v185_v62 = vmul.f32 %v164_v23, %v141_v38  ;;  %v186_v63 = vmul.f32 %v168_v24, %v142_v44  ;;  %v221_v0 = vadd.f32 %v200_v37, %v177_v50  ;;  %v222_v1 = vadd.f32 %v204_v39, %v178_v51 }
 0x170   :  { %v223_v41 = vadd.f32 %v208_v46, %v179_v53  ;;  %v224_v2 = vadd.f32 %v212_v48, %v180_v54  ;;  %v225_v42 = vadd.f32 %v192_v25, %v181_v58  ;;  %v226_v3 = vadd.f32 %v196_v26, %v182_v59 }
 0x171   :  { %v227_v43 = vadd.f32 %v200_v37, %v183_v60  ;;  %v228_v47 = vadd.f32 %v204_v39, %v184_v61  ;;  %v229_v52 = vadd.f32 %v208_v46, %v185_v62  ;;  %v230_v57 = vadd.f32 %v212_v48, %v186_v63 }
 0x172   :  { %v297_v4 = vpack.c.bf16 %v220_v56, %v219_v55  ;;  %v298_v5 = vpack.c.bf16 %v222_v1, %v221_v0  ;;  %v299_v6 = vpack.c.bf16 %v224_v2, %v223_v41  ;;  %v300_v7 = vpack.c.bf16 %v226_v3, %v225_v42 }
 0x173   :  { %v301_v8 = vpack.c.bf16 %v228_v47, %v227_v43  ;;  %v302_v9 = vpack.c.bf16 %v230_v57, %v229_v52 }
 0x174   :  { %267 = vst [vmem:[#allocation8] sm:$0xff] %v297_v4  ;;  %268 = vst [vmem:[#allocation8 + $0x8] sm:$0xff] %v298_v5 }
 0x175   :  { %269 = vst [vmem:[#allocation8 + $0x10] sm:$0xff] %v299_v6  ;;  %270 = vst [vmem:[#allocation8 + $0x18] sm:$0xff] %v300_v7 }
 0x176   :  { %271 = vst [vmem:[#allocation8 + $0x20] sm:$0xff] %v301_v8  ;;  %272 = vst [vmem:[#allocation8 + $0x28] sm:$0xff] %v302_v9 }
 0x177   :  { %384 = shalt.err (!%p381_p5)
}
 0x178   :  { %284 = dma.vmem_to_hbm [thread:$0]  %s279_s2, 768, %s491_s3, [#allocation4], %s401_s20, %s401_s20, %s402_s21  }
 0x179   :  { %397 = dma.done.wait [#allocation4], 768  }
 0x17a   :  { %398 = vsyncadd [#allocation4], 4294966528 }
 0x17b   :  { %288 = vsyncpa [#allocation3], 1 }
 0x17c   :  { %289 = vsyncpa [#allocation6], 1 }
 0x17d   :  { %290 = vsyncpa [#allocation4], 1 }

</bundles_post_ra>
